<compile_context>
chip_gen: v6e
topology: v6e:2x2x1
jax: 0.10.0
libtpu: 0.0.40
codegen_flags: <defaults>
</compile_context>

<pallas_src>
import functools

import jax
import jax.numpy as jnp
from jax.experimental import pallas as pl
from jax.experimental.pallas import tpu as pltpu

EPS = 1e-5          # nn.BatchNorm1d default eps
LANE = 128
SUBLANE = 8


def _round_up(v, m):
    return (v + m - 1) // m * m


# ------------------------------ in-kernel helpers ------------------------------

def _shift_down(p):
    """out[r] = p[r-1]; out[0] = 0.  (rows = sublane axis, f32 (TR, C))"""
    zero = jnp.zeros_like(p[:1])
    return jnp.concatenate([zero, p[:-1]], axis=0)


def _shift_up(p):
    """out[r] = p[r+1]; out[-1] = 0."""
    zero = jnp.zeros_like(p[:1])
    return jnp.concatenate([p[1:], zero], axis=0)


def _conv3_rows(x_tile, w_ref):
    """k=3 'same' conv on flat rows: out[r] = sum_k x[r-1+k] @ W[k].

    x_tile: (TR, Cin_p) in the MXU compute dtype; w_ref: (3, Cin_p, Cout_p) ref.
    Each tap is a single big 2-D MXU matmul with f32 accumulation; the +/-1 row
    shift is applied to the f32 product (cheap, layout-friendly) instead of
    building a padded copy of the input.  Per-batch pad rows inside the tile
    provide the conv zero padding, so tiles never need a cross-tile halo.
    """
    p0 = jnp.dot(x_tile, w_ref[0], preferred_element_type=jnp.float32)
    p1 = jnp.dot(x_tile, w_ref[1], preferred_element_type=jnp.float32)
    p2 = jnp.dot(x_tile, w_ref[2], preferred_element_type=jnp.float32)
    return _shift_down(p0) + p1 + _shift_up(p2)


def _interior_mask(rows, lp, l):
    """(rows, 1) f32 mask: 1.0 on real sequence rows, 0.0 on per-batch pad rows."""
    p = jax.lax.broadcasted_iota(jnp.int32, (rows, 1), 0) % lp
    return jnp.logical_and(p >= 1, p <= l).astype(jnp.float32)


# ----------------------------------- kernels -----------------------------------

def _conv1_stats_kernel(x_ref, w1_ref, h_ref, s_ref, ss_ref, *, lp, l):
    # x_ref: (TR, Cin_p), w1_ref: (3, Cin_p, Cout_p)
    # h_ref: (TR, Cout_p), s_ref/ss_ref: (1, 1, Cout_p) per-tile partial BN1 stats
    h = _conv3_rows(x_ref[...], w1_ref)                       # f32 (TR, Cout_p)
    mask = _interior_mask(h.shape[0], lp, l)
    hm = h * mask
    s_ref[...] = jnp.sum(hm, axis=0, keepdims=True)[None]     # sum  over real rows
    ss_ref[...] = jnp.sum(hm * h, axis=0, keepdims=True)[None]  # sumsq over real rows
    h_ref[...] = h.astype(h_ref.dtype)


def _bn1_conv2_stats_kernel(h_ref, w2_ref, scale1_ref, shift1_ref,
                            h2_ref, s_ref, ss_ref, *, lp, l):
    # BN1 apply (precomputed scale/shift -> one FMA per element) + ReLU, then zero the
    # pad rows (this IS conv2's zero padding), then conv2 + partial BN2 stats.
    mask = _interior_mask(h_ref.shape[0], lp, l)
    a = jnp.maximum(h_ref[...].astype(jnp.float32) * scale1_ref[...] + shift1_ref[...],
                    0.0) * mask
    h2 = _conv3_rows(a.astype(h_ref.dtype), w2_ref)           # f32 (TR, Cout_p)
    h2m = h2 * mask
    s_ref[...] = jnp.sum(h2m, axis=0, keepdims=True)[None]
    ss_ref[...] = jnp.sum(h2m * h2, axis=0, keepdims=True)[None]
    h2_ref[...] = h2.astype(h2_ref.dtype)


def _bn2_relu_kernel(h2_ref, scale2_ref, shift2_ref, y_ref):
    h2 = h2_ref[...].astype(jnp.float32)
    y_ref[...] = jnp.maximum(h2 * scale2_ref[...] + shift2_ref[...], 0.0).astype(y_ref.dtype)


# ----------------------------------- wrapper ------------------------------------

def _pick_tile_batches(n, lp, target_rows=512):
    """Largest divisor of n whose tile (tb * lp rows) stays near ~512 rows."""
    cap = max(1, target_rows // lp)
    best = 1
    for d in range(1, n + 1):
        if n % d == 0 and d <= cap:
            best = d
    return best


def double_conv(x, w1, g1, b1, w2, g2, b2, *,
                compute_dtype=jnp.bfloat16, tile_batches=None):
    """Fused DoubleConv forward (training-mode BatchNorm, matching PyTorch).

    x: (N, Cin, L) f32 (PyTorch NCL).  w*: (Cout, Cin|Cout, 3) PyTorch Conv1d layout.
    compute_dtype: dtype fed to the MXU (bf16 by default; accumulation, BN statistics
    and all element-wise math stay f32).  Pass jnp.float32 for bit-accurate-ish output.
    """
    N, Cin, L = x.shape
    Cout = w1.shape[0]

    Lp = _round_up(L + 2, SUBLANE)        # per-batch rows: 1 pad + L + 1 pad (+ align)
    Cin_p = _round_up(Cin, LANE)          # lane-dense channels
    Cout_p = _round_up(Cout, LANE)

    if tile_batches is None:
        tile_batches = _pick_tile_batches(N, Lp)
    assert N % tile_batches == 0, (N, tile_batches)
    num_tiles = N // tile_batches
    TR = tile_batches * Lp                # rows per tile (multiple of 8)
    R = N * Lp
    # NOTE: for very long L a further intra-batch L split (with a 1-row halo) would be
    # needed to bound TR; at typical DoubleConv sizes whole-batch tiles fit VMEM easily.

    # ---- layout glue: NCL -> flat channels-last rows, zero pad rows & lanes ----
    x_rows = jnp.zeros((N, Lp, Cin_p), compute_dtype)
    x_rows = x_rows.at[:, 1:L + 1, :Cin].set(
        jnp.transpose(x, (0, 2, 1)).astype(compute_dtype))
    x_rows = x_rows.reshape(R, Cin_p)

    w1_p = jnp.zeros((3, Cin_p, Cout_p), compute_dtype)
    w1_p = w1_p.at[:, :Cin, :Cout].set(jnp.transpose(w1, (2, 1, 0)).astype(compute_dtype))
    w2_p = jnp.zeros((3, Cout_p, Cout_p), compute_dtype)
    w2_p = w2_p.at[:, :Cout, :Cout].set(jnp.transpose(w2, (2, 1, 0)).astype(compute_dtype))

    def pad_vec(v):
        return jnp.zeros((Cout_p,), jnp.float32).at[:Cout].set(v.astype(jnp.float32))

    g1p, b1p, g2p, b2p = pad_vec(g1), pad_vec(b1), pad_vec(g2), pad_vec(b2)

    cparams = pltpu.CompilerParams(
        dimension_semantics=("parallel",),     # tiles independent -> megacore-friendly
        vmem_limit_bytes=32 * 1024 * 1024,     # headroom within v7x's 64 MiB VMEM
    )

    row_in_spec = pl.BlockSpec((TR, Cin_p), lambda i: (i, 0))
    row_mid_spec = pl.BlockSpec((TR, Cout_p), lambda i: (i, 0))
    stat_spec = pl.BlockSpec((1, 1, Cout_p), lambda i: (i, 0, 0))
    vec_spec = pl.BlockSpec((1, Cout_p), lambda i: (0, 0))
    w1_spec = pl.BlockSpec((3, Cin_p, Cout_p), lambda i: (0, 0, 0))
    w2_spec = pl.BlockSpec((3, Cout_p, Cout_p), lambda i: (0, 0, 0))

    count = float(N * L)   # BN stats are over (N, L) per channel

    # ---- pass 1: conv1 + fused per-tile BN1 partial stats ----
    h_rows, s1, ss1 = pl.pallas_call(
        functools.partial(_conv1_stats_kernel, lp=Lp, l=L),
        grid=(num_tiles,),
        in_specs=(row_in_spec, w1_spec),
        out_specs=(row_mid_spec, stat_spec, stat_spec),
        out_shape=(
            jax.ShapeDtypeStruct((R, Cout_p), compute_dtype),
            jax.ShapeDtypeStruct((num_tiles, 1, Cout_p), jnp.float32),
            jax.ShapeDtypeStruct((num_tiles, 1, Cout_p), jnp.float32),
        ),
        compiler_params=cparams,
    )(x_rows, w1_p)

    mean1 = jnp.sum(s1, axis=(0, 1)) / count
    var1 = jnp.maximum(jnp.sum(ss1, axis=(0, 1)) / count - mean1 * mean1, 0.0)
    scale1 = g1p * jax.lax.rsqrt(var1 + EPS)
    shift1 = b1p - mean1 * scale1

    # ---- pass 2: BN1 apply + ReLU + conv2 + fused per-tile BN2 partial stats ----
    h2_rows, s2, ss2 = pl.pallas_call(
        functools.partial(_bn1_conv2_stats_kernel, lp=Lp, l=L),
        grid=(num_tiles,),
        in_specs=(row_mid_spec, w2_spec, vec_spec, vec_spec),
        out_specs=(row_mid_spec, stat_spec, stat_spec),
        out_shape=(
            jax.ShapeDtypeStruct((R, Cout_p), compute_dtype),
            jax.ShapeDtypeStruct((num_tiles, 1, Cout_p), jnp.float32),
            jax.ShapeDtypeStruct((num_tiles, 1, Cout_p), jnp.float32),
        ),
        compiler_params=cparams,
    )(h_rows, w2_p, scale1.reshape(1, Cout_p), shift1.reshape(1, Cout_p))

    mean2 = jnp.sum(s2, axis=(0, 1)) / count
    var2 = jnp.maximum(jnp.sum(ss2, axis=(0, 1)) / count - mean2 * mean2, 0.0)
    scale2 = g2p * jax.lax.rsqrt(var2 + EPS)
    shift2 = b2p - mean2 * scale2

    # ---- pass 3: BN2 apply + ReLU ----
    y_rows = pl.pallas_call(
        _bn2_relu_kernel,
        grid=(num_tiles,),
        in_specs=(row_mid_spec, vec_spec, vec_spec),
        out_specs=pl.BlockSpec((TR, Cout_p), lambda i: (i, 0)),
        out_shape=jax.ShapeDtypeStruct((R, Cout_p), jnp.float32),
        compiler_params=cparams,
    )(h2_rows, scale2.reshape(1, Cout_p), shift2.reshape(1, Cout_p))

    # drop pad rows / pad lanes, back to PyTorch NCL f32 (module semantics)
    y = y_rows.reshape(N, Lp, Cout_p)[:, 1:L + 1, :Cout]
    return jnp.transpose(y, (0, 2, 1))


# ---------------------------------- reference -----------------------------------

def _ref_double_conv(x, w1, g1, b1, w2, g2, b2):
    """Pure-JAX reference matching PyTorch DoubleConv forward (training-mode BN)."""
    def conv(x, w):
        return jax.lax.conv_general_dilated(
            x, w, window_strides=(1,), padding=((1, 1),),
            dimension_numbers=("NCH", "OIH", "NCH"))

    def bn_relu(h, g, b):
        mean = h.mean(axis=(0, 2), keepdims=True)
        var = ((h - mean) ** 2).mean(axis=(0, 2), keepdims=True)
        h = (h - mean) / jnp.sqrt(var + EPS) * g[None, :, None] + b[None, :, None]
        return jnp.maximum(h, 0.0)

    h = bn_relu(conv(x, w1), g1, b1)
    return bn_relu(conv(h, w2), g2, b2)


if __name__ == "__main__":
    N, Cin, Cout, L = 2, 4, 8, 16

    key = jax.random.PRNGKey(0)
    k1, k2, k3, k4, k5, k6, kx = jax.random.split(key, 7)

    # Deterministic synthetic parameters (shapes follow nn.Conv1d / nn.BatchNorm1d)
    w1 = 0.2 * jax.random.normal(k1, (Cout, Cin, 3), jnp.float32)
    w2 = 0.2 * jax.random.normal(k2, (Cout, Cout, 3), jnp.float32)
    g1 = 1.0 + 0.1 * jax.random.normal(k3, (Cout,), jnp.float32)
    b1 = 0.1 * jax.random.normal(k4, (Cout,), jnp.float32)
    g2 = 1.0 + 0.1 * jax.random.normal(k5, (Cout,), jnp.float32)
    b2 = 0.1 * jax.random.normal(k6, (Cout,), jnp.float32)

    x = jax.random.normal(kx, (N, Cin, L), jnp.float32)

    ref = _ref_double_conv(x, w1, g1, b1, w2, g2, b2)

    # Exact path: f32 MXU inputs, must match the f32 reference tightly.
    # tile_batches=1 forces a 2-step grid even at this tiny shape, so the tiled
    # two-phase BN-stats path is actually exercised.
    out_f32 = jax.block_until_ready(
        double_conv(x, w1, g1, b1, w2, g2, b2,
                    compute_dtype=jnp.float32, tile_batches=1))
    assert out_f32.shape == (N, Cout, L), out_f32.shape
    assert jnp.allclose(out_f32, ref, rtol=1e-4, atol=1e-4), \
        float(jnp.max(jnp.abs(out_f32 - ref)))

    # Perf path (default): bf16 MXU inputs, f32 accumulation and f32 BN statistics.
    # Looser tolerance accounts for the bf16 input rounding (per perf review).
    out_bf16 = jax.block_until_ready(
        double_conv(x, w1, g1, b1, w2, g2, b2,
                    compute_dtype=jnp.bfloat16, tile_batches=1))
    assert out_bf16.shape == (N, Cout, L), out_bf16.shape
    assert jnp.allclose(out_bf16, ref, rtol=5e-2, atol=5e-2), \
        float(jnp.max(jnp.abs(out_bf16 - ref)))

    print("KERNEL_OK")
</pallas_src>

<mosaic_0001>
module attributes {stable_mosaic.version = 11 : i64} {
  func.func @_conv1_stats_kernel(%arg0: i32, %arg1: memref<24x128xf32, #tpu.memory_space<vmem>>, %arg2: memref<3x128x128xf32, #tpu.memory_space<vmem>>, %arg3: memref<24x128xf32, #tpu.memory_space<vmem>>, %arg4: memref<1x1x128xf32, #tpu.memory_space<vmem>>, %arg5: memref<1x1x128xf32, #tpu.memory_space<vmem>>) attributes {dimension_semantics = [#tpu.dimension_semantics<parallel>], iteration_bounds = array<i64: 2>, scalar_prefetch = 0 : i64, scratch_operands = 0 : i64, tpu.core_type = #tpu.core_type<tc>, window_params = [{transform_indices = @transform_0, window_bounds = array<i64: 24, 128>}, {pipeline_mode = #tpu.pipeline_mode<synchronous>, transform_indices = @transform_1, window_bounds = array<i64: 3, 128, 128>}, {transform_indices = @transform_2, window_bounds = array<i64: 24, 128>}, {transform_indices = @transform_3, window_bounds = array<i64: 1, 1, 128>}, {transform_indices = @transform_4, window_bounds = array<i64: 1, 1, 128>}]} {
    %c0 = arith.constant 0 : index
    %c0_0 = arith.constant 0 : index
    %0 = vector.load %arg1[%c0, %c0_0] : memref<24x128xf32, #tpu.memory_space<vmem>>, vector<24x128xf32>
    %c0_1 = arith.constant 0 : index
    %c0_2 = arith.constant 0 : index
    %c0_3 = arith.constant 0 : index
    %1 = vector.load %arg2[%c0_1, %c0_2, %c0_3] : memref<3x128x128xf32, #tpu.memory_space<vmem>>, vector<1x128x128xf32>
    %2 = vector.shape_cast %1 : vector<1x128x128xf32> to vector<128x128xf32>
    %cst = arith.constant dense<0.000000e+00> : vector<24x128xf32>
    %3 = tpu.matmul %0, %2, %cst {dimension_numbers = #tpu.dot_dimension_numbers<[1], [0], [0], [1], [0, 0, 1, 1], [], []>} : vector<24x128xf32>, vector<128x128xf32>, vector<24x128xf32> -> vector<24x128xf32>
    %c1 = arith.constant 1 : index
    %c0_4 = arith.constant 0 : index
    %c0_5 = arith.constant 0 : index
    %4 = vector.load %arg2[%c1, %c0_4, %c0_5] : memref<3x128x128xf32, #tpu.memory_space<vmem>>, vector<1x128x128xf32>
    %5 = vector.shape_cast %4 : vector<1x128x128xf32> to vector<128x128xf32>
    %cst_6 = arith.constant dense<0.000000e+00> : vector<24x128xf32>
    %6 = tpu.matmul %0, %5, %cst_6 {dimension_numbers = #tpu.dot_dimension_numbers<[1], [0], [0], [1], [0, 0, 1, 1], [], []>} : vector<24x128xf32>, vector<128x128xf32>, vector<24x128xf32> -> vector<24x128xf32>
    %c2 = arith.constant 2 : index
    %c0_7 = arith.constant 0 : index
    %c0_8 = arith.constant 0 : index
    %7 = vector.load %arg2[%c2, %c0_7, %c0_8] : memref<3x128x128xf32, #tpu.memory_space<vmem>>, vector<1x128x128xf32>
    %8 = vector.shape_cast %7 : vector<1x128x128xf32> to vector<128x128xf32>
    %cst_9 = arith.constant dense<0.000000e+00> : vector<24x128xf32>
    %9 = tpu.matmul %0, %8, %cst_9 {dimension_numbers = #tpu.dot_dimension_numbers<[1], [0], [0], [1], [0, 0, 1, 1], [], []>} : vector<24x128xf32>, vector<128x128xf32>, vector<24x128xf32> -> vector<24x128xf32>
    %cst_10 = arith.constant 0.000000e+00 : f32
    %10 = vector.broadcast %cst_10 : f32 to vector<1x128xf32>
    %11 = vector.extract_strided_slice %3 {offsets = [0, 0], sizes = [23, 128], strides = [1, 1]} : vector<24x128xf32> to vector<23x128xf32>
    %12 = tpu.concatenate %10, %11 in 0 : vector<1x128xf32>, vector<23x128xf32> -> vector<24x128xf32>
    %13 = arith.addf %12, %6 : vector<24x128xf32>
    %cst_11 = arith.constant 0.000000e+00 : f32
    %14 = vector.broadcast %cst_11 : f32 to vector<1x128xf32>
    %15 = vector.extract_strided_slice %9 {offsets = [1, 0], sizes = [23, 128], strides = [1, 1]} : vector<24x128xf32> to vector<23x128xf32>
    %16 = tpu.concatenate %15, %14 in 0 : vector<23x128xf32>, vector<1x128xf32> -> vector<24x128xf32>
    %17 = arith.addf %13, %16 : vector<24x128xf32>
    %18 = tpu.iota {dimensions = array<i32: 0>} : vector<24x1xi32>
    %c24_i32 = arith.constant 24 : i32
    %c0_i32 = arith.constant 0 : i32
    %19 = arith.cmpi eq, %c24_i32, %c0_i32 : i32
    %c1_i32 = arith.constant 1 : i32
    %20 = arith.select %19, %c1_i32, %c24_i32 : i32
    %21 = vector.broadcast %20 : i32 to vector<24x1xi32>
    %22 = arith.remsi %18, %21 : vector<24x1xi32>
    %c0_i32_12 = arith.constant 0 : i32
    %23 = vector.broadcast %c0_i32_12 : i32 to vector<24x1xi32>
    %24 = arith.cmpi ne, %22, %23 : vector<24x1xi32>
    %c0_i32_13 = arith.constant 0 : i32
    %25 = vector.broadcast %c0_i32_13 : i32 to vector<24x1xi32>
    %26 = arith.cmpi slt, %22, %25 : vector<24x1xi32>
    %c0_i32_14 = arith.constant 0 : i32
    %27 = arith.cmpi slt, %20, %c0_i32_14 : i32
    %28 = vector.broadcast %27 : i1 to vector<24x1xi1>
    %29 = vector.broadcast %28 : vector<24x1xi1> to vector<24x1xi1>
    %30 = arith.xori %26, %29 : vector<24x1xi1>
    %31 = arith.andi %30, %24 : vector<24x1xi1>
    %32 = vector.broadcast %20 : i32 to vector<24x1xi32>
    %33 = arith.addi %22, %32 : vector<24x1xi32>
    %34 = arith.select %31, %33, %22 : vector<24x1xi1>, vector<24x1xi32>
    %c1_i32_15 = arith.constant 1 : i32
    %35 = vector.broadcast %c1_i32_15 : i32 to vector<24x1xi32>
    %36 = arith.cmpi sge, %34, %35 : vector<24x1xi32>
    %c16_i32 = arith.constant 16 : i32
    %37 = vector.broadcast %c16_i32 : i32 to vector<24x1xi32>
    %38 = arith.cmpi sle, %34, %37 : vector<24x1xi32>
    %39 = arith.andi %36, %38 : vector<24x1xi1>
    %40 = arith.extui %39 : vector<24x1xi1> to vector<24x1xi32>
    %41 = arith.sitofp %40 : vector<24x1xi32> to vector<24x1xf32>
    %42 = vector.broadcast %41 : vector<24x1xf32> to vector<24x128xf32>
    %43 = arith.mulf %17, %42 : vector<24x128xf32>
    %cst_16 = arith.constant dense<0.000000e+00> : vector<128xf32>
    %44 = vector.multi_reduction <add>, %43, %cst_16 [0] : vector<24x128xf32> to vector<128xf32>
    %45 = vector.shape_cast %44 : vector<128xf32> to vector<1x128xf32>
    %46 = vector.shape_cast %45 : vector<1x128xf32> to vector<1x1x128xf32>
    %c0_17 = arith.constant 0 : index
    %c0_18 = arith.constant 0 : index
    %c0_19 = arith.constant 0 : index
    %47 = vector.load %arg4[%c0_17, %c0_18, %c0_19] : memref<1x1x128xf32, #tpu.memory_space<vmem>>, vector<1x1x128xf32>
    tpu.vector_store %arg4[%c0_17, %c0_18, %c0_19], %46 {strides = array<i32>} : memref<1x1x128xf32, #tpu.memory_space<vmem>>, vector<1x1x128xf32>,
    %48 = arith.mulf %43, %17 : vector<24x128xf32>
    %cst_20 = arith.constant dense<0.000000e+00> : vector<128xf32>
    %49 = vector.multi_reduction <add>, %48, %cst_20 [0] : vector<24x128xf32> to vector<128xf32>
    %50 = vector.shape_cast %49 : vector<128xf32> to vector<1x128xf32>
    %51 = vector.shape_cast %50 : vector<1x128xf32> to vector<1x1x128xf32>
    %c0_21 = arith.constant 0 : index
    %c0_22 = arith.constant 0 : index
    %c0_23 = arith.constant 0 : index
    %52 = vector.load %arg5[%c0_21, %c0_22, %c0_23] : memref<1x1x128xf32, #tpu.memory_space<vmem>>, vector<1x1x128xf32>
    tpu.vector_store %arg5[%c0_21, %c0_22, %c0_23], %51 {strides = array<i32>} : memref<1x1x128xf32, #tpu.memory_space<vmem>>, vector<1x1x128xf32>,
    %c0_24 = arith.constant 0 : index
    %c0_25 = arith.constant 0 : index
    %53 = vector.load %arg3[%c0_24, %c0_25] : memref<24x128xf32, #tpu.memory_space<vmem>>, vector<24x128xf32>
    tpu.vector_store %arg3[%c0_24, %c0_25], %17 {strides = array<i32>} : memref<24x128xf32, #tpu.memory_space<vmem>>, vector<24x128xf32>,
    return
  }
  func.func @transform_0(%arg0: i32) -> (i32, i32) {
    %c0_i32 = arith.constant 0 : i32
    %c0_i32_0 = arith.constant 0 : i32
    return %arg0, %c0_i32 : i32, i32
  }
  func.func @transform_1(%arg0: i32) -> (i32, i32, i32) {
    %c0_i32 = arith.constant 0 : i32
    %c0_i32_0 = arith.constant 0 : i32
    %c0_i32_1 = arith.constant 0 : i32
    %c0_i32_2 = arith.constant 0 : i32
    return %c0_i32, %c0_i32_0, %c0_i32_1 : i32, i32, i32
  }
  func.func @transform_2(%arg0: i32) -> (i32, i32) {
    %c0_i32 = arith.constant 0 : i32
    %c0_i32_0 = arith.constant 0 : i32
    return %arg0, %c0_i32 : i32, i32
  }
  func.func @transform_3(%arg0: i32) -> (i32, i32, i32) {
    %c0_i32 = arith.constant 0 : i32
    %c0_i32_0 = arith.constant 0 : i32
    %c0_i32_1 = arith.constant 0 : i32
    return %arg0, %c0_i32, %c0_i32_0 : i32, i32, i32
  }
  func.func @transform_4(%arg0: i32) -> (i32, i32, i32) {
    %c0_i32 = arith.constant 0 : i32
    %c0_i32_0 = arith.constant 0 : i32
    %c0_i32_1 = arith.constant 0 : i32
    return %arg0, %c0_i32, %c0_i32_0 : i32, i32, i32
  }
}

</mosaic_0001>

<bundles_post_ra>
// kernel: tpu_custom_call.1
= control target key start
LH: loop header
LB: loop body
LE: loop exit
PB: predicated region body
PF: predicated region fallthrough
CT: control target
= control target key end

     0   :  { %10 = vsyncpa [#allocation3], 0  ;;  %s1766_s0 = inlined_call_operand.hbm [shape: f32[48,128], index: 0, kind: input, shape index: {}]   ;;  %s1767_s1 = inlined_call_operand.hbm [shape: f32[3,128,128], index: 1, kind: input, shape index: {}]   ;;  %s1768_s2 = inlined_call_operand.hbm [shape: f32[48,128], index: 2, kind: output, shape index: {0}]   ;;  %s1769_s3 = inlined_call_operand.hbm [shape: f32[2,1,128], index: 3, kind: output, shape index: {1}]   ;;  %s1770_s4 = inlined_call_operand.hbm [shape: f32[2,1,128], index: 4, kind: output, shape index: {2}]  }
   0x1   :  { %12 = vsyncpa [#allocation3 + $0x1], 0 }
   0x2   :  { %13 = vsyncpa [#allocation6], 0 }
   0x3   :  { %14 = vsyncpa [#allocation4], 0 }
   0x4   :  { %16 = vsyncpa [#allocation4 + $0x1], 0 }
   0x5   :  { %17 = vsyncpa [#allocation9], 0 }
   0x6   :  { %19 = vsyncpa [#allocation9 + $0x1], 0  ;;  %s1378_s15 = smov 0   ;;  %s1380_s16 = smov 0  }
   0x7   :  { %s1382_s17 = smov 0   ;;  %s1384_s18 = smov 0  }
   0x8 LB: > { %s1399_s19 = sadd.s32 4294967295, %s1340_s18   ;;  %s1771_s20 = sadd.s32 4294967294, %s1340_s18   ;;  %s1340_s18 = sphi %s1384_s18, %s1796_s18   ;;  %s1336_s17 = sphi %s1382_s17, %s1795_s17   ;;  %s1332_s16 = sphi %s1380_s16, %s1794_s16   ;;  %s1328_s15 = sphi %s1378_s15, %s1793_s15  }
   0x9   : > { %p45_p0 = scmp.ne.s32.totalorder %s1332_s16, %s1328_s15  ;;  %p1772_p1 = scmp.eq.s32.totalorder %s1399_s19, 0 }
   0xa   : > { %p96_p3 = scmp.eq.s32.totalorder %s1771_s20, 1  ;;  %p853_p5 = scmp.ge.s32.totalorder %s1340_s18, 1 }
   0xb   : > { %p1410_p4 = por %p1772_p1, %p45_p0  ;;  %p155_p7 = scmp.lt.s32.totalorder %s1340_s18, 3 }
   0xc   : > { %p1415_p6 = por %p96_p3, %p45_p0  ;;  %s1342_s24 = smov [#allocation5]  }
   0xd   : > { %s1776_s21 = scalar_select %p1410_p4, 1, 0 }
   0xe   : > { %s1777_s22 = scalar_select %p1415_p6, 1, 0 }
   0xf   : > { %p1420_p8 = pnand %p853_p5, %p155_p7  ;;  %s167_s25 = sshll.u32 %s1342_s24, 4  ;;  %s168_s25 = int_to_ptr.vmem [resolvable:$true] %s167_s25 }
  0x10   : > { %s1434_s27 = sadd.s32 1, %s1340_s18   ;;  %s32_s28 = sadd.s32 1, %s1336_s17 }
  0x11   : > { %s1778_s23 = scalar_select %p1420_p8, 1, 0 }
  0x12   : > { %p1101_p9 = pneg %p1420_p8  ;;  %s29_s29 = ssub.s32 %s1340_s18, %s1434_s27 }
  0x13   : > { %s1173_s30 = scalar_lea.vmem %s168_s25, 6144  ;;  %p1181_p5 = scmp.lt.s32.totalorder %s168_s25, %s168_s25 }
  0x14   : > { %p1429_p11 = pnand %p1101_p9, %p1772_p1  ;;  %p1174_p13 = scmp.ne.s32.totalorder %s168_s25, %s1173_s30 }
  0x15   : > { %p1182_p7 = scmp.lt.s32.totalorder %s1173_s30, %s1173_s30 }
  0x16   : > { %p1164_p12 = pneg %p1429_p11 }
  0x17   : > { %p1183_p10 = por %p1182_p7, %p1181_p5 }
  0x18   : > { %p1176_p0 = pnand %p1174_p13, %p1164_p12 }
  0x1a   : > { %p1177_p3 = pneg %p1176_p0 }
  0x1c   : > { %p1184_p2 = pnand %p1183_p10, %p1177_p3 }
  0x1e   : > { %1187 = shalt.err (!%p1184_p2)
}
  0x1f   : > { %s1343_s5 = smov 128   ;;  %s1344_s6 = smov 8  }
  0x20   : > { %1104 = dma.hbm_to_vmem [thread:$0]  (!%p1429_p11), %s1767_s1, 6144, %s168_s25, [#allocation6], %s1343_s5, %s1343_s5, %s1344_s6  }
  0x21   : > { %p30_p2 = scmp.eq.s32.totalorder %s29_s29, 0  ;;  %p39_p9 = scmp.ne.s32.totalorder %s1336_s17, %s1332_s16 }
  0x22   : > { %p40_p10 = scmp.eq.s32.totalorder %s1340_s18, 0  ;;  %p1120_p12 = scmp.lt.s32.totalorder %s1340_s18, 2 }
  0x23   : > { %s1454_s9 = scalar_select %p30_p2, %s1336_s17, %s32_s28  }
  0x24   : > { %p41_p13 = por %p40_p10, %p39_p9  ;;  %p1780_p0 = scmp.eq.s32.totalorder %s1399_s19, 1 }
  0x25   : > { %s181_s11 = sand.u32 1, %s1336_s17   ;;  %s867_s12 = smul.u32 384, %s1340_s18 }
  0x26   : > { %p1458_p3 = por %p1780_p0, %p39_p9  ;;  %s1081_s13 = smul.u32 24, %s181_s11 }
  0x27   : > { %p1464_p5 = pnand %p1120_p12, %p41_p13  ;;  %s1471_s26 = scalar_lea.hbm %s1766_s0, %s867_s12 }
  0x28   : > { %s1781_s10 = scalar_select %p1458_p3, 1, 0 }
  0x29   : > { %s185_s28 = scalar_lea.vmem [#allocation2], %s1081_s13  ;;  %s1475_s30 = scalar_lea.sflag [#allocation3], %s181_s11 }
  0x2a   : > { %s192_s29 = sshll.u32 %s185_s28, 4  ;;  %s1188_s7 = scalar_lea.hbm %s1471_s26, 384  ;;  %s1473_s29 = int_to_ptr.vmem [resolvable:$true] %s192_s29 }
  0x2b   : > { %p1189_p11 = scmp.ne.s32.totalorder %s1471_s26, %s1188_s7  ;;  %p1190_p7 = pneg %p1464_p5 }
  0x2c   : > { %s1193_s12 = scalar_lea.hbm %s1766_s0, 768  ;;  %p1194_p10 = scmp.lt.s32.totalorder %s1471_s26, %s1766_s0 }
  0x2d   : > { %p1191_p2 = pnand %p1190_p7, %p1189_p11  ;;  %p1195_p12 = scmp.lt.s32.totalorder %s1193_s12, %s1188_s7 }
  0x2f   : > { %p1192_p9 = pneg %p1191_p2  ;;  %p1196_p13 = por %p1195_p12, %p1194_p10 }
  0x31   : > { %p1197_p0 = pnand %p1196_p13, %p1192_p9 }
  0x33   : > { %1200 = shalt.err (!%p1197_p0)
}
  0x34   : > { %s1201_s11 = scalar_lea.vmem %s1473_s29, 384  ;;  %s1345_s13 = smov [#allocation2]  }
  0x35   : > { %p1202_p1 = scmp.ne.s32.totalorder %s1473_s29, %s1201_s11  ;;  %s1206_s28 = sshll.u32 %s1345_s13, 4  ;;  %s1207_s28 = int_to_ptr.vmem [resolvable:$false] %s1206_s28 }
  0x36   : > { %s1208_s8 = scalar_lea.vmem %s1207_s28, 768  ;;  %p1209_p2 = scmp.lt.s32.totalorder %s1473_s29, %s1207_s28 }
  0x37   : > { %p1204_p6 = pnand %p1202_p1, %p1190_p7  ;;  %p1210_p3 = scmp.lt.s32.totalorder %s1208_s8, %s1201_s11 }
  0x39   : > { %p1205_p11 = pneg %p1204_p6  ;;  %p1211_p4 = por %p1210_p3, %p1209_p2 }
  0x3b   : > { %p1212_p8 = pnand %p1211_p4, %p1205_p11 }
  0x3d   : > { %1215 = shalt.err (!%p1212_p8)
}
  0x3e   : > { %1108 = dma.hbm_to_vmem [thread:$0]  (!%p1464_p5), %s1471_s26, 384, %s1473_s29, %s1475_s30, %s1343_s5, %s1343_s5, %s1344_s6  }
  0x3f   : > { %p1783_p1 = scmp.ne.s32.totalorder %s1778_s23, 0 }
  0x40   : > { %s1502_s20 = sand.u32 (!%p1783_p1), 1, %s1332_s16   ;;  %p1784_p4 = scmp.ne.s32.totalorder (!%p1783_p1), %s1776_s21, 0 }
  0x41   : > { %204 = sbr.rel (%p1783_p1) target bundleno = 410 (0x19a), region = 28  ;;  %s207_s24 = scalar_lea.sflag (!%p1783_p1), [#allocation3], %s1502_s20 }
  0x42   : > { %s1082_s7 = smul.u32 (!%p1783_p1), 24, %s1502_s20 }
  0x44   : > { %s1508_s14 = scalar_lea.vmem (!%p1783_p1), [#allocation2], %s1082_s7 }
  0x46   : > { %1311 = dma.done.wait (%p1784_p4), %s207_s24, 384  }
  0x47   : > { %1313 = vsyncadd (%p1784_p4), %s207_s24, 4294966912  ;;  %p1785_p6 = scmp.eq.s32.totalorder %s1399_s19, 0 }
  0x49   : > { %1315 = dma.done.wait (%p1785_p6), [#allocation6], 6144   ;;  %p1786_p8 = pmov %p1785_p6 }
  0x4a   : > { %v1346_v0 = vmov 0.0   ;;  %vm1347_vm0 = vmmov 0   ;;  %v267_v1 = vld [vmem:[#allocation5 + $0x78] sm:$0xff]  ;;  %v266_v3 = vld [vmem:[#allocation5 + $0x70] sm:$0xff]  ;;  %v265_v5 = vld [vmem:[#allocation5 + $0x68] sm:$0xff]  ;;  %v574_v52 = vlaneseq  ;;  %vm545_vm10 = vcmask 1040384  }
  0x4b   : > { %1317 = vsyncadd (%p1786_p8), [#allocation6], 4294961152  ;;  %926 = vmatprep.subr.mxu0 %v1346_v0  ;;  %967 = vmatprep.subr.mxu1 %v1346_v0  ;;  %v364_v2 = vld [vmem:[#allocation5 + $0xf8] sm:$0xff]  ;;  %v363_v4 = vld [vmem:[#allocation5 + $0xf0] sm:$0xff]  ;;  %vm561_vm13 = vcmask 1046528   ;;  %s234_s21 = scalar_lea.vmem [#allocation7], %s1082_s7 }
  0x4c   : > { %958 = vmatprep.mubr.msk.f32.mxu0 %vm1347_vm0, %v1346_v0  ;;  %999 = vmatprep.mubr.msk.f32.mxu1 %vm1347_vm0, %v1346_v0  ;;  %v362_v6 = vld [vmem:[#allocation5 + $0xe8] sm:$0xff]  ;;  %v264_v7 = vld [vmem:[#allocation5 + $0x60] sm:$0xff]  ;;  %v263_v9 = vld [vmem:[#allocation5 + $0x58] sm:$0xff]  ;;  %v575_v57 = vshrl.u32 %v574_v52, 7  ;;  %s690_s23 = sshll.u32 %s234_s21, 4  ;;  %s868_s5 = smul.u32 384, %s1399_s19  ;;  %s1644_s23 = int_to_ptr.vmem [resolvable:$true] %s690_s23 }
  0x4d   : > { %927 = vmatpush3.msra.mxu0 %v267_v1  ;;  %968 = vmatpush3.msra.mxu1 %v364_v2  ;;  %v361_v8 = vld [vmem:[#allocation5 + $0xe0] sm:$0xff]  ;;  %v360_v10 = vld [vmem:[#allocation5 + $0xd8] sm:$0xff]  ;;  %v262_v11 = vld [vmem:[#allocation5 + $0x50] sm:$0xff]  ;;  %s669_s30 = scalar_lea.sflag [#allocation4], %s1502_s20  ;;  %s1216_s12 = scalar_lea.vmem %s1644_s23, 384 }
  0x4e   : > { %928 = vmatprep.subr.mxu0 %v1346_v0  ;;  %969 = vmatprep.subr.mxu1 %v1346_v0  ;;  %v359_v12 = vld [vmem:[#allocation5 + $0xd0] sm:$0xff]  ;;  %v261_v13 = vld [vmem:[#allocation5 + $0x48] sm:$0xff]  ;;  %v260_v15 = vld [vmem:[#allocation5 + $0x40] sm:$0xff]  ;;  %v576_v58 = vadd.s32 8, %v575_v57  ;;  %v577_v60 = vadd.s32 16, %v575_v57  ;;  %s1655_s29 = scalar_lea.hbm %s1768_s2, %s868_s5  ;;  %p1217_p3 = scmp.ne.s32.totalorder %s1644_s23, %s1216_s12 }
  0x4f   : > { %929 = vmatpush3.msra.mxu0 %v266_v3  ;;  %970 = vmatpush3.msra.mxu1 %v363_v4  ;;  %v358_v14 = vld [vmem:[#allocation5 + $0xc8] sm:$0xff]  ;;  %v357_v16 = vld [vmem:[#allocation5 + $0xc0] sm:$0xff]  ;;  %v259_v17 = vld [vmem:[#allocation5 + $0x38] sm:$0xff]  ;;  %v1615_v61 = vmul.u32.u64.low 2863311531, %v575_v57  ;;  %v1616_v62 = vmul.u32.u64.high 2863311531, %v575_v57, %v1615_v61  ;;  %p1789_p5 = scmp.ne.s32.totalorder %s1781_s10, 0 }
  0x50   : > { %930 = vmatprep.subr.mxu0 %v1346_v0  ;;  %971 = vmatprep.subr.mxu1 %v1346_v0  ;;  %v356_v18 = vld [vmem:[#allocation5 + $0xb8] sm:$0xff]  ;;  %v258_v19 = vld [vmem:[#allocation5 + $0x30] sm:$0xff]  ;;  %v257_v21 = vld [vmem:[#allocation5 + $0x28] sm:$0xff]  ;;  %v1618_v1 = vmul.u32.u64.low 2863311531, %v576_v58  ;;  %v1619_v2 = vmul.u32.u64.high 2863311531, %v576_v58, %v1618_v1  ;;  %s1348_s25 = smov [#allocation7]  }
  0x51   : > { %931 = vmatpush3.msra.mxu0 %v265_v5  ;;  %972 = vmatpush3.msra.mxu1 %v362_v6  ;;  %v355_v20 = vld [vmem:[#allocation5 + $0xb0] sm:$0xff]  ;;  %v354_v22 = vld [vmem:[#allocation5 + $0xa8] sm:$0xff]  ;;  %v256_v23 = vld [vmem:[#allocation5 + $0x20] sm:$0xff]  ;;  %v1621_v3 = vmul.u32.u64.low 2863311531, %v577_v60  ;;  %v1622_v4 = vmul.u32.u64.high 2863311531, %v577_v60, %v1621_v3  ;;  %p1218_p7 = pnand %p1217_p3, %p1789_p5  ;;  %s1220_s11 = sshll.u32 %s1348_s25, 4  ;;  %s1221_s11 = int_to_ptr.vmem [resolvable:$false] %s1220_s11 }
  0x52   : > { %932 = vmatprep.subr.mxu0 %v1346_v0  ;;  %973 = vmatprep.subr.mxu1 %v1346_v0  ;;  %v353_v24 = vld [vmem:[#allocation5 + $0xa0] sm:$0xff]  ;;  %v255_v25 = vld [vmem:[#allocation5 + $0x18] sm:$0xff]  ;;  %v254_v27 = vld [vmem:[#allocation5 + $0x10] sm:$0xff]  ;;  %s1222_s13 = scalar_lea.vmem %s1221_s11, 768  ;;  %p1223_p10 = scmp.lt.s32.totalorder %s1644_s23, %s1221_s11 }
  0x53   : > { %933 = vmatpush3.msra.mxu0 %v264_v7  ;;  %974 = vmatpush3.msra.mxu1 %v361_v8  ;;  %v352_v26 = vld [vmem:[#allocation5 + $0x98] sm:$0xff]  ;;  %v351_v28 = vld [vmem:[#allocation5 + $0x90] sm:$0xff]  ;;  %v253_v29 = vld [vmem:[#allocation5 + $0x8] sm:$0xff]  ;;  %v584_v7 = vshrl.u32 %v1616_v62, 4  ;;  %v595_v8 = vshrl.u32 %v1619_v2, 4  ;;  %p1219_p9 = pneg %p1218_p7  ;;  %p1224_p12 = scmp.lt.s32.totalorder %s1222_s13, %s1216_s12 }
  0x54   : > { %934 = vmatprep.subr.mxu0 %v1346_v0  ;;  %975 = vmatprep.subr.mxu1 %v1346_v0  ;;  %v350_v30 = vld [vmem:[#allocation5 + $0x88] sm:$0xff]  ;;  %v252_v31 = vld [vmem:[#allocation5] sm:$0xff]  ;;  %v461_v34 = vld [vmem:[#allocation5 + $0x178] sm:$0xff] }
  0x55   : > { %935 = vmatpush3.msra.mxu0 %v263_v9  ;;  %976 = vmatpush3.msra.mxu1 %v360_v10  ;;  %v349_v32 = vld [vmem:[#allocation5 + $0x80] sm:$0xff]  ;;  %v1553_v33 = vld [vmem:[%s1508_s14] sm:$0xff]  ;;  %v1564_v36 = vld [vmem:[%s1508_s14 + $0x8] sm:$0xff]  ;;  %v606_v9 = vshrl.u32 %v1622_v4, 4  ;;  %v585_v10 = vmul.u32 24, %v584_v7  ;;  %p1225_p13 = por %p1224_p12, %p1223_p10 }
  0x56   : > { %936 = vmatprep.subr.mxu0 %v1346_v0  ;;  %977 = vmatprep.subr.mxu1 %v1346_v0  ;;  %v460_v35 = vld [vmem:[#allocation5 + $0x170] sm:$0xff]  ;;  %v459_v37 = vld [vmem:[#allocation5 + $0x168] sm:$0xff]  ;;  %v458_v38 = vld [vmem:[#allocation5 + $0x160] sm:$0xff] }
  0x57   : > { %937 = vmatpush3.msra.mxu0 %v262_v11  ;;  %978 = vmatpush3.msra.mxu1 %v359_v12  ;;  %v457_v39 = vld [vmem:[#allocation5 + $0x158] sm:$0xff]  ;;  %v456_v40 = vld [vmem:[#allocation5 + $0x150] sm:$0xff]  ;;  %v455_v41 = vld [vmem:[#allocation5 + $0x148] sm:$0xff]  ;;  %v596_v11 = vmul.u32 24, %v595_v8  ;;  %v607_v12 = vmul.u32 24, %v606_v9  ;;  %p1226_p0 = pnand %p1225_p13, %p1219_p9 }
  0x58   : > { %938 = vmatprep.subr.mxu0 %v1346_v0  ;;  %979 = vmatprep.subr.mxu1 %v1346_v0  ;;  %v454_v42 = vld [vmem:[#allocation5 + $0x140] sm:$0xff]  ;;  %v453_v43 = vld [vmem:[#allocation5 + $0x138] sm:$0xff]  ;;  %v452_v44 = vld [vmem:[#allocation5 + $0x130] sm:$0xff] }
  0x59   : > { %939 = vmatpush3.msra.mxu0 %v261_v13  ;;  %980 = vmatpush3.msra.mxu1 %v358_v14  ;;  %v451_v45 = vld [vmem:[#allocation5 + $0x128] sm:$0xff]  ;;  %v450_v46 = vld [vmem:[#allocation5 + $0x120] sm:$0xff]  ;;  %v449_v48 = vld [vmem:[#allocation5 + $0x118] sm:$0xff]  ;;  %v586_v13 = vsub.s32 %v575_v57, %v585_v10  ;;  %v597_v14 = vsub.s32 %v576_v58, %v596_v11 }
  0x5a   : > { %940 = vmatprep.subr.mxu0 %v1346_v0  ;;  %981 = vmatprep.subr.mxu1 %v1346_v0  ;;  %v251_v47 = vld [vmem:[%s1508_s14 + $0x10] sm:$0xff]  ;;  %v448_v49 = vld [vmem:[#allocation5 + $0x110] sm:$0xff]  ;;  %v447_v50 = vld [vmem:[#allocation5 + $0x108] sm:$0xff] }
  0x5b   : > { %941 = vmatpush3.msra.mxu0 %v260_v15  ;;  %982 = vmatpush3.msra.mxu1 %v357_v16  ;;  %v446_v51 = vld [vmem:[#allocation5 + $0x100] sm:$0xff]  ;;  %v608_v15 = vsub.s32 %v577_v60, %v607_v12  ;;  %vm611_vm1 = vcmp.ne.s32.totalorder %v586_v13, 0  ;;  %vm614_vm2 = vcmp.lt.s32.totalorder %v586_v13, 0  ;;  %vm612_vm3 = vcmp.ne.s32.totalorder %v597_v14, 0 }
  0x5c   : > { %942 = vmatprep.subr.mxu0 %v1346_v0  ;;  %983 = vmatprep.subr.mxu1 %v1346_v0  ;;  %vm615_vm4 = vcmp.lt.s32.totalorder %v597_v14, 0  ;;  %vm617_vm7 = vmand %vm614_vm2, %vm611_vm1 }
  0x5d   : > { %943 = vmatpush3.msra.mxu0 %v259_v17  ;;  %984 = vmatpush3.msra.mxu1 %v356_v18  ;;  %v620_v17 = vadd.s32 24, %v586_v13  ;;  %vm613_vm5 = vcmp.ne.s32.totalorder %v608_v15, 0  ;;  %vm616_vm6 = vcmp.lt.s32.totalorder %v608_v15, 0  ;;  %vm618_vm8 = vmand %vm615_vm4, %vm612_vm3 }
  0x5e   : > { %944 = vmatprep.subr.mxu0 %v1346_v0  ;;  %985 = vmatprep.subr.mxu1 %v1346_v0  ;;  %vm619_vm9 = vmand %vm616_vm6, %vm613_vm5 }
  0x5f   : > { %945 = vmatpush3.msra.mxu0 %v258_v19  ;;  %986 = vmatpush3.msra.mxu1 %v355_v20  ;;  %v621_v20 = vadd.s32 24, %v597_v14 }
  0x60   : > { %946 = vmatprep.subr.mxu0 %v1346_v0  ;;  %987 = vmatprep.subr.mxu1 %v1346_v0 }
  0x61   : > { %947 = vmatpush3.msra.mxu0 %v257_v21  ;;  %988 = vmatpush3.msra.mxu1 %v354_v22  ;;  %v622_v21 = vadd.s32 24, %v608_v15 }
  0x62   : > { %948 = vmatprep.subr.mxu0 %v1346_v0  ;;  %989 = vmatprep.subr.mxu1 %v1346_v0 }
  0x63   : > { %949 = vmatpush3.msra.mxu0 %v256_v23  ;;  %990 = vmatpush3.msra.mxu1 %v353_v24  ;;  %v623_v24 = vsel %vm617_vm7, %v620_v17, %v586_v13 }
  0x64   : > { %950 = vmatprep.subr.mxu0 %v1346_v0  ;;  %991 = vmatprep.subr.mxu1 %v1346_v0  ;;  %vm626_vm11 = vcmp.ge.s32.totalorder %v623_v24, 1  ;;  %vm629_vm12 = vcmp.le.s32.totalorder %v623_v24, 16 }
  0x65   : > { %951 = vmatpush3.msra.mxu0 %v255_v25  ;;  %992 = vmatpush3.msra.mxu1 %v352_v26  ;;  %v624_v25 = vsel %vm618_vm8, %v621_v20, %v597_v14  ;;  %v625_v26 = vsel %vm619_vm9, %v622_v21, %v608_v15  ;;  %vm632_vm2 = vmand %vm626_vm11, %vm629_vm12 }
  0x66   : > { %952 = vmatprep.subr.mxu0 %v1346_v0  ;;  %993 = vmatprep.subr.mxu1 %v1346_v0  ;;  %vm627_vm14 = vcmp.ge.s32.totalorder %v624_v25, 1  ;;  %vm630_vm15 = vcmp.le.s32.totalorder %v624_v25, 16  ;;  %vm631_vm1 = vcmp.le.s32.totalorder %v625_v26, 16 }
  0x67   : > { %953 = vmatpush3.msra.mxu0 %v254_v27  ;;  %994 = vmatpush3.msra.mxu1 %v351_v28  ;;  %vm1635_vm3 = vmand %vm627_vm14, %vm630_vm15 }
  0x68   : > { %954 = vmatprep.subr.mxu0 %v1346_v0  ;;  %995 = vmatprep.subr.mxu1 %v1346_v0 }
  0x69   : > { %955 = vmatpush3.msra.mxu0 %v253_v29  ;;  %996 = vmatpush3.msra.mxu1 %v350_v30 }
  0x6a   : > { %956 = vmatprep.subr.mxu0 %v1346_v0  ;;  %997 = vmatprep.subr.mxu1 %v1346_v0 }
  0x6b   : > { %957 = vmatpush3.msra.mxu0 %v252_v31  ;;  %998 = vmatpush3.msra.mxu1 %v349_v32 }
  0x6c   : > { %959 = vmatmul.mubr.f32.vlgmr.msra.gmra.mxu0 %v1553_v33  ;;  %1000 = vmatmul.mubr.f32.vlgmr.msra.gmra.mxu1 %v1553_v33 }
  0x6d   : > { %1008 = vmatprep.subr.mxu0 %v1346_v0  ;;  %1049 = vmatprep.subr.mxu1 %v1346_v0 }
  0x6e   : > { %1009 = vmatpush3.msra.mxu0 %v461_v34  ;;  %1065 = vmatpush3.msra.mxu1 %v461_v34 }
  0x6f   : > { %1010 = vmatprep.subr.mxu0 %v1346_v0  ;;  %1050 = vmatprep.subr.mxu1 %v1346_v0 }
  0x70   : > { %1011 = vmatpush3.msra.mxu0 %v460_v35  ;;  %1066 = vmatpush3.msra.mxu1 %v460_v35 }
  0x71   : > { %961 = vmatprep.mubr.msk.f32.mxu0 %vm1347_vm0, %v1346_v0  ;;  %1012 = vmatprep.subr.mxu0 %v1346_v0 }
  0x72   : > { %1051 = vmatprep.subr.mxu1 %v1346_v0  ;;  %962 = vmatmul.mubr.f32.gmra.mxu0 %v1564_v36 }
  0x73   : > { %1013 = vmatpush3.msra.mxu0 %v459_v37  ;;  %1067 = vmatpush3.msra.mxu1 %v459_v37 }
  0x74   : > { %1014 = vmatprep.subr.mxu0 %v1346_v0  ;;  %1052 = vmatprep.subr.mxu1 %v1346_v0 }
  0x75   : > { %1002 = vmatprep.mubr.msk.f32.mxu1 %vm1347_vm0, %v1346_v0  ;;  %1015 = vmatpush3.msra.mxu0 %v458_v38 }
  0x76   : > { %1068 = vmatpush3.msra.mxu1 %v458_v38  ;;  %1016 = vmatprep.subr.mxu0 %v1346_v0 }
  0x77   : > { %1003 = vmatmul.mubr.f32.gmra.mxu1 %v1564_v36  ;;  %1053 = vmatprep.subr.mxu1 %v1346_v0 }
  0x78   : > { %1017 = vmatpush3.msra.mxu0 %v457_v39  ;;  %1069 = vmatpush3.msra.mxu1 %v457_v39 }
  0x79   : > { %1018 = vmatprep.subr.mxu0 %v1346_v0  ;;  %1054 = vmatprep.subr.mxu1 %v1346_v0 }
  0x7a   : > { %1019 = vmatpush3.msra.mxu0 %v456_v40  ;;  %1070 = vmatpush3.msra.mxu1 %v456_v40 }
  0x7b   : > { %1020 = vmatprep.subr.mxu0 %v1346_v0  ;;  %1055 = vmatprep.subr.mxu1 %v1346_v0 }
  0x7c   : > { %1021 = vmatpush3.msra.mxu0 %v455_v41  ;;  %1071 = vmatpush3.msra.mxu1 %v455_v41 }
  0x7d   : > { %1022 = vmatprep.subr.mxu0 %v1346_v0  ;;  %1056 = vmatprep.subr.mxu1 %v1346_v0 }
  0x7e   : > { %1023 = vmatpush3.msra.mxu0 %v454_v42  ;;  %1072 = vmatpush3.msra.mxu1 %v454_v42 }
  0x7f   : > { %1024 = vmatprep.subr.mxu0 %v1346_v0  ;;  %1057 = vmatprep.subr.mxu1 %v1346_v0 }
  0x80   : > { %1025 = vmatpush3.msra.mxu0 %v453_v43  ;;  %1073 = vmatpush3.msra.mxu1 %v453_v43 }
  0x81   : > { %1026 = vmatprep.subr.mxu0 %v1346_v0  ;;  %1058 = vmatprep.subr.mxu1 %v1346_v0 }
  0x82   : > { %1027 = vmatpush3.msra.mxu0 %v452_v44  ;;  %1074 = vmatpush3.msra.mxu1 %v452_v44  ;;  %v859_v44 = vsel %vm632_vm2, 1.0, %v1346_v0 }
  0x83   : > { %1028 = vmatprep.subr.mxu0 %v1346_v0  ;;  %1059 = vmatprep.subr.mxu1 %v1346_v0 }
  0x84   : > { %1029 = vmatpush3.msra.mxu0 %v451_v45  ;;  %1075 = vmatpush3.msra.mxu1 %v451_v45 }
  0x85   : > { %1030 = vmatprep.subr.mxu0 %v1346_v0  ;;  %1060 = vmatprep.subr.mxu1 %v1346_v0 }
  0x86   : > { %1031 = vmatpush3.msra.mxu0 %v450_v46  ;;  %1076 = vmatpush3.msra.mxu1 %v450_v46 }
  0x87   : > { %964 = vmatprep.mubr.msk.f32.mxu0 %vm1347_vm0, %v1346_v0  ;;  %1032 = vmatprep.subr.mxu0 %v1346_v0 }
  0x88   : > { %1061 = vmatprep.subr.mxu1 %v1346_v0  ;;  %965 = vmatmul.mubr.f32.gmra.mxu0 %v251_v47 }
  0x89   : > { %1005 = vmatprep.mubr.msk.f32.mxu1 %vm1347_vm0, %v1346_v0  ;;  %1033 = vmatpush3.msra.mxu0 %v449_v48 }
  0x8a   : > { %1077 = vmatpush3.msra.mxu1 %v449_v48  ;;  %1034 = vmatprep.subr.mxu0 %v1346_v0 }
  0x8b   : > { %1006 = vmatmul.mubr.f32.gmra.mxu1 %v251_v47  ;;  %1062 = vmatprep.subr.mxu1 %v1346_v0 }
  0x8c   : > { %1035 = vmatpush3.msra.mxu0 %v448_v49  ;;  %1078 = vmatpush3.msra.mxu1 %v448_v49 }
  0x8d   : > { %1036 = vmatprep.subr.mxu0 %v1346_v0  ;;  %1063 = vmatprep.subr.mxu1 %v1346_v0 }
  0x8e   : > { %1037 = vmatpush3.msra.mxu0 %v447_v50  ;;  %1079 = vmatpush3.msra.mxu1 %v447_v50  ;;  %v860_v50 = vsel %vm1635_vm3, 1.0, %v1346_v0 }
  0x8f   : > { %1038 = vmatprep.subr.mxu0 %v1346_v0  ;;  %1064 = vmatprep.subr.mxu1 %v1346_v0 }
  0x90   : > { %1039 = vmatpush3.msra.mxu0 %v446_v51  ;;  %1080 = vmatpush3.msra.mxu1 %v446_v51 }
  0x91   : > { %1040 = vmatprep.mubr.msk.f32.mxu0 %vm1347_vm0, %v1346_v0  ;;  %1043 = vmatprep.mubr.msk.f32.mxu1 %vm1347_vm0, %v1346_v0 }
  0x92   : > { %1041 = vmatmul.mubr.f32.vlgmr.msra.gmra.mxu0 %v1553_v33  ;;  %1044 = vmatmul.mubr.f32.vlgmr.msra.gmra.mxu1 %v1564_v36 }
  0x93   : > { %1046 = vmatprep.mubr.msk.f32.mxu1 %vm1347_vm0, %v1346_v0  ;;  %vm628_vm0 = vcmp.ge.s32.totalorder %v625_v26, 1 }
  0x94   : > { %vm634_vm4 = vmand %vm628_vm0, %vm631_vm1 }
  0x95   : > { %v861_v51 = vsel %vm634_vm4, 1.0, %v1346_v0 }
  0x96   : > { %1047 = vmatmul.mubr.f32.gmra.mxu1 %v251_v47 }
 0x12c   : > { %v1613_v53 = vpop.f32.mrf.mxu0  ;;  %v431_v54 = vpop.f32.mrf.mxu1 }
 0x12d   : > { %v546_v22 = vrot.slane %v1613_v53, 7 }
 0x12e   : > { %v1001_v55 = vpop.f32.mrf.mxu1  ;;  %v960_v56 = vpop.f32.mrf.mxu0 }
 0x12f   : > { %v554_v27 = vsel %vm545_vm10, 0.0, %v546_v22 }
 0x130   : > { %v555_v34 = vadd.f32 %v554_v27, %v431_v54 }
 0x132   : > { %v339_v59 = vpop.f32.mrf.mxu0 }
 0x133   : > { %v547_v28 = vrot.slane %v339_v59, 7 }
 0x134   : > { %v963_v63 = vpop.f32.mrf.mxu0 }
 0x135   : > { %v548_v37 = vsel %vm545_vm10, %v546_v22, %v547_v28 }
 0x137   : > { %v1624_v5 = vpop.f32.mrf.mxu1 }
 0x138   : > { %v556_v45 = vadd.f32 %v548_v37, %v1624_v5 }
 0x139   : > { %v1004_v6 = vpop.f32.mrf.mxu1 }
 0x148   : > { %v344_v16 = vpop.f32.mrf.mxu0 }
 0x149   : > { %v549_v29 = vrot.slane %v344_v16, 7 }
 0x14a   : > { %v966_v18 = vpop.f32.mrf.mxu0 }
 0x14b   : > { %v441_v19 = vpop.f32.mrf.mxu1  ;;  %v550_v38 = vsel %vm545_vm10, %v547_v28, %v549_v29 }
 0x14c   : > { %v557_v46 = vadd.f32 %v550_v38, %v441_v19 }
 0x14d   : > { %v1007_v23 = vpop.f32.mrf.mxu1 }
 0x152   : > { %v528_v30 = vpop.f32.mrf.mxu0  ;;  %v533_v31 = vpop.f32.mrf.mxu1 }
 0x153   : > { %v562_v32 = vrot.slane %v528_v30, 1  ;;  %v563_v33 = vrot.slane %v533_v31, 1 }
 0x154   : > { %v1045_v35 = vpop.f32.mrf.mxu1  ;;  %v1042_v36 = vpop.f32.mrf.mxu0 }
 0x155   : > { %v564_v39 = vsel %vm561_vm13, %v562_v32, %v563_v33 }
 0x156   : > { %v538_v41 = vpop.f32.mrf.mxu1  ;;  %v571_v42 = vadd.f32 %v564_v39, %v555_v34 }
 0x157   : > { %v565_v43 = vrot.slane %v538_v41, 1 }
 0x158   : > { %665 = vst [vmem:[%s234_s21] sm:$0xff] %v571_v42  ;;  %v1048_v47 = vpop.f32.mrf.mxu1  ;;  %v641_v54 = vmul.f32 %v859_v44, %v571_v42 }
 0x159   : > { %v566_v48 = vsel %vm561_vm13, %v563_v33, %v565_v43  ;;  %v570_v49 = vsel %vm561_vm13, %v565_v43, 0.0 }
 0x15a   : > { %v572_v52 = vadd.f32 %v566_v48, %v556_v45  ;;  %v573_v53 = vadd.f32 %v570_v49, %v557_v46 }
 0x15c   : > { %v642_v55 = vmul.f32 %v860_v50, %v572_v52  ;;  %v643_v56 = vmul.f32 %v861_v51, %v573_v53  ;;  %666 = vst [vmem:[%s234_s21 + $0x8] sm:$0xff] %v572_v52  ;;  %667 = vst [vmem:[%s234_s21 + $0x10] sm:$0xff] %v573_v53 }
 0x15d   : > { %1229 = shalt.err (!%p1226_p0)
}
 0x15e   : > { %s1230_s28 = scalar_lea.hbm %s1655_s29, 384  ;;  %s1234_s24 = scalar_lea.hbm %s1768_s2, 768 }
 0x15f   : > { %p1231_p11 = scmp.ne.s32.totalorder %s1655_s29, %s1230_s28  ;;  %p1235_p4 = scmp.lt.s32.totalorder %s1655_s29, %s1768_s2 }
 0x160   : > { %p1236_p6 = scmp.lt.s32.totalorder %s1234_s24, %s1230_s28 }
 0x161   : > { %p1232_p2 = pnand %p1231_p11, %p1789_p5 }
 0x162   : > { %p1237_p8 = por %p1236_p6, %p1235_p4 }
 0x163   : > { %p1233_p1 = pneg %p1232_p2 }
 0x165   : > { %p1238_p3 = pnand %p1237_p8, %p1233_p1 }
 0x167   : > { %1241 = shalt.err (!%p1238_p3)
}
 0x168   : > { %s1349_s5 = smov 128   ;;  %s1350_s6 = smov 8   ;;  %v644_v0 = vadd.f32 %v642_v55, %v641_v54  ;;  %v653_v57 = vmul.f32 %v641_v54, %v571_v42  ;;  %v654_v58 = vmul.f32 %v642_v55, %v572_v52  ;;  %v655_v60 = vmul.f32 %v643_v56, %v573_v53 }
 0x169   : > { %1095 = dma.vmem_to_hbm [thread:$0]  (%p1789_p5), %s1644_s23, 384, %s1655_s29, %s669_s30, %s1349_s5, %s1349_s5, %s1350_s6  }
 0x16a   : > { %v645_v59 = vadd.f32 %v644_v0, %v643_v56  ;;  %v656_v61 = vadd.f32 %v654_v58, %v653_v57  ;;  %s673_s26 = sand.u32 1, %s1399_s19   ;;  %s863_s23 = sshll.u32 %s1399_s19, 4 }
 0x16b   : > { %s240_s29 = scalar_lea.vmem [#allocation8], %s1502_s20  ;;  %s246_s12 = scalar_lea.vmem [#allocation10], %s1502_s20 }
 0x16c   : > { %v646_v62 = vrot.slane %v645_v59, 4  ;;  %v657_v63 = vadd.f32 %v656_v61, %v655_v60  ;;  %s706_s30 = sshll.u32 %s240_s29, 4  ;;  %s719_s25 = sshll.u32 %s246_s12, 4  ;;  %s1691_s30 = int_to_ptr.vmem [resolvable:$true] %s706_s30  ;;  %s1698_s25 = int_to_ptr.vmem [resolvable:$true] %s719_s25 }
 0x16d   : > { %s1689_s28 = scalar_lea.hbm %s1769_s3, %s863_s23  ;;  %s1696_s7 = scalar_lea.hbm %s1770_s4, %s863_s23 }
 0x16e   : > { %v647_v1 = vadd.f32 %v646_v62, %v645_v59  ;;  %v658_v2 = vrot.slane %v657_v63, 4  ;;  %s1700_s24 = scalar_lea.sflag [#allocation9], %s673_s26  ;;  %s1242_s14 = scalar_lea.vmem %s1691_s30, 16 }
 0x16f   : > { %p1243_p7 = scmp.ne.s32.totalorder %s1691_s30, %s1242_s14  ;;  %s1351_s21 = smov [#allocation8]  }
 0x170   : > { %v648_v3 = vrot.slane %v647_v1, 2  ;;  %v659_v4 = vadd.f32 %v658_v2, %v657_v63  ;;  %s1246_s5 = sshll.u32 %s1351_s21, 4  ;;  %s1247_s5 = int_to_ptr.vmem [resolvable:$false] %s1246_s5 }
 0x171   : > { %p1244_p9 = pnand %p1243_p7, %p1789_p5  ;;  %s1248_s6 = scalar_lea.vmem %s1247_s5, 32 }
 0x172   : > { %v660_v5 = vrot.slane %v659_v4, 2  ;;  %v649_v6 = vadd.f32 %v648_v3, %v647_v1  ;;  %p1249_p12 = scmp.lt.s32.totalorder %s1691_s30, %s1247_s5  ;;  %p1250_p13 = scmp.lt.s32.totalorder %s1248_s6, %s1242_s14 }
 0x173   : > { %p1245_p10 = pneg %p1244_p9 }
 0x174   : > { %v661_v7 = vadd.f32 %v660_v5, %v659_v4  ;;  %v650_v8 = vrot.slane %v649_v6, 1  ;;  %p1251_p0 = por %p1250_p13, %p1249_p12 }
 0x176   : > { %v651_v9 = vadd.f32 %v650_v8, %v649_v6  ;;  %v662_v10 = vrot.slane %v661_v7, 1  ;;  %p1252_p11 = pnand %p1251_p0, %p1245_p10 }
 0x178   : > { %652 = vst [vmem:[%s240_s29] sm:$0x1] %v651_v9  ;;  %v663_v11 = vadd.f32 %v662_v10, %v661_v7 }
 0x179   : > { %1255 = shalt.err (!%p1252_p11)
}
 0x17a   : > { %s1256_s26 = scalar_lea.hbm %s1689_s28, 16  ;;  %s1260_s11 = scalar_lea.hbm %s1769_s3, 32 }
 0x17b   : > { %p1257_p2 = scmp.ne.s32.totalorder %s1689_s28, %s1256_s26  ;;  %p1261_p6 = scmp.lt.s32.totalorder %s1689_s28, %s1769_s3 }
 0x17c   : > { %p1262_p8 = scmp.lt.s32.totalorder %s1260_s11, %s1256_s26 }
 0x17d   : > { %p1258_p1 = pnand %p1257_p2, %p1789_p5 }
 0x17e   : > { %p1263_p3 = por %p1262_p8, %p1261_p6 }
 0x17f   : > { %p1259_p4 = pneg %p1258_p1 }
 0x181   : > { %p1264_p7 = pnand %p1263_p3, %p1259_p4 }
 0x183   : > { %1267 = shalt.err (!%p1264_p7)
}
 0x184   : > { %1096 = dma.vmem_to_hbm [thread:$0]  (%p1789_p5), %s1691_s30, 16, %s1689_s28, %s1700_s24   ;;  %664 = vst [vmem:[%s246_s12] sm:$0x1] %v663_v11 }
 0x185   : > { %s1268_s8 = scalar_lea.vmem %s1698_s25, 16  ;;  %s1352_s14 = smov [#allocation10]  }
 0x186   : > { %p1269_p9 = scmp.ne.s32.totalorder %s1698_s25, %s1268_s8  ;;  %s1272_s21 = sshll.u32 %s1352_s14, 4  ;;  %s1273_s21 = int_to_ptr.vmem [resolvable:$false] %s1272_s21 }
 0x187   : > { %s1274_s5 = scalar_lea.vmem %s1273_s21, 32  ;;  %p1275_p13 = scmp.lt.s32.totalorder %s1698_s25, %s1273_s21 }
 0x188   : > { %p1270_p10 = pnand %p1269_p9, %p1789_p5  ;;  %p1276_p0 = scmp.lt.s32.totalorder %s1274_s5, %s1268_s8 }
 0x18a   : > { %p1271_p12 = pneg %p1270_p10  ;;  %p1277_p11 = por %p1276_p0, %p1275_p13 }
 0x18c   : > { %p1278_p2 = pnand %p1277_p11, %p1271_p12 }
 0x18e   : > { %1281 = shalt.err (!%p1278_p2)
}
 0x18f   : > { %s1282_s20 = scalar_lea.hbm %s1696_s7, 16  ;;  %s1286_s28 = scalar_lea.hbm %s1770_s4, 32 }
 0x190   : > { %p1283_p1 = scmp.ne.s32.totalorder %s1696_s7, %s1282_s20  ;;  %p1287_p8 = scmp.lt.s32.totalorder %s1696_s7, %s1770_s4 }
 0x191   : > { %p1288_p3 = scmp.lt.s32.totalorder %s1286_s28, %s1282_s20 }
 0x192   : > { %p1284_p4 = pnand %p1283_p1, %p1789_p5 }
 0x193   : > { %p1289_p7 = por %p1288_p3, %p1287_p8 }
 0x194   : > { %p1285_p6 = pneg %p1284_p4 }
 0x196   : > { %p1290_p9 = pnand %p1289_p7, %p1285_p6 }
 0x198   : > { %1293 = shalt.err (!%p1290_p9)
}
 0x199   : > { %1097 = dma.vmem_to_hbm [thread:$0]  (%p1789_p5), %s1698_s25, 16, %s1696_s7, %s1700_s24  }
 0x19a PF: > { %s731_s23 = sand.u32 1, %s1328_s15   ;;  %p1790_p10 = scmp.ne.s32.totalorder %s1777_s22, 0 }
 0x19b   : > { %p1791_p12 = scmp.ge.s32.totalorder %s1340_s18, 2  ;;  %s732_s29 = scalar_lea.sflag [#allocation4], %s731_s23 }
 0x19d   : > { %p1110_p13 = pnand %p1791_p12, %p1790_p10 }
 0x19f   : > { %p1111_p0 = pneg %p1110_p13 }
 0x1a1   : > { %1319 = dma.done.wait (%p1111_p0), %s732_s29, 384  }
 0x1a2   : > { %1321 = vsyncadd (%p1111_p0), %s732_s29, 4294966912  ;;  %s1792_s11 = sadd.s32 4294967294, %s1340_s18  }
 0x1a3   : > { %s740_s13 = sand.u32 1, %s1792_s11  }
 0x1a4   : > { %s741_s10 = scalar_lea.sflag [#allocation9], %s740_s13 }
 0x1a5   : > { %1323 = dma.done.wait (%p1111_p0), %s741_s10, 32  }
 0x1a6   : > { %1325 = vsyncadd (%p1111_p0), %s741_s10, 4294967264  ;;  %p22_p5 = scmp.ge.s32.totalorder %s1434_s27, 4   ;;  %s1793_s15 = smov %s1332_s16 }
 0x1a7   : > { %s1794_s16 = smov %s1336_s17  ;;  %s1795_s17 = smov %s1454_s9 }
 0x1a8   : > { %s1796_s18 = smov %s1434_s27  ;;  %24 = sbr.rel (!%p22_p5) target bundleno = 8 (0x8), region = 111 }
 0x1ad   :  { %753 = vsyncpa [#allocation3], 1 }
 0x1ae   :  { %755 = vsyncpa [#allocation3 + $0x1], 1 }
 0x1af   :  { %756 = vsyncpa [#allocation6], 1 }
 0x1b0   :  { %757 = vsyncpa [#allocation4], 1 }
 0x1b1   :  { %759 = vsyncpa [#allocation4 + $0x1], 1 }
 0x1b2   :  { %760 = vsyncpa [#allocation9], 1 }
 0x1b3   :  { %762 = vsyncpa [#allocation9 + $0x1], 1 }

</bundles_post_ra>
